<compile_context>
chip_gen: v7x
topology: tpu7x:2x2x1
jax: 0.10.0
libtpu: 0.0.40
codegen_flags: <defaults>
</compile_context>

<pallas_src>
import functools

import jax
import jax.numpy as jnp
from jax.experimental import pallas as pl
from jax.experimental.pallas import tpu as pltpu


# -------------------------- kernels -------------------------- #

def _smear_rows_kernel(dist_ref, offset_ref, out_ref, *, coeff):
    # dist_ref: (TM, 1); offset_ref: (1, G); out_ref: (TM, G).
    d = dist_ref[...] - offset_ref[...]                 # (TM,1)-(1,G) -> (TM,G)
    out_ref[...] = jnp.exp(coeff * d * d)


def _smear_cols_kernel(dist_ref, offset_ref, out_ref, *, coeff):
    # Lane-dense layout: dist_ref (1, TN); offset_ref (G, 1); out_ref (G, TN),
    # TN a multiple of 128 -> every output store is a full, unmasked vst.
    d = dist_ref[...] - offset_ref[...]                 # (1,TN)-(G,1) -> (G,TN)
    out_ref[...] = jnp.exp(coeff * d * d)


def _smear_linear_kernel(dist_ref, offset_ref, w_ref, b_ref, out_ref, *, coeff):
    # Fused RBF + Linear: the (TM, G) RBF block stays in VMEM / vregs.
    d = dist_ref[...] - offset_ref[...]                 # (TM, G)
    rbf = jnp.exp(coeff * d * d)
    out_ref[...] = (jnp.dot(rbf, w_ref[...], preferred_element_type=jnp.float32)
                    + b_ref[...])


# -------------------------- helpers -------------------------- #

def _round_up(x, m):
    return -(-x // m) * m


def _pick_tile(n, tile, align):
    """Clamp the tile for small inputs; if everything would fit in a single
    block, split into two so both v7x TensorCores get work ("parallel" axis
    is a no-op on single-TC v5e/v6e)."""
    tile = max(align, min(int(tile), _round_up(n, align)))
    if n <= tile and n >= 2 * align:
        tile = _round_up(pl.cdiv(n, 2), align)
    return int(tile)


def _padded_tile_bytes(r, c, itemsize=4):
    # VMEM tiles are (8, 128)-padded, which is exactly why the (tm, 1) dist
    # block and the 50-wide output block cost more than their logical size.
    return _round_up(r, 8) * _round_up(c, 128) * itemsize


def _compiler_params(*block_rc):
    # Double-buffered footprint of all pipelined blocks + headroom. Default
    # tiles need ~8 MiB; cap the requested limit at v7x's 64 MiB physical VMEM.
    need = 2 * sum(_padded_tile_bytes(r, c) for r, c in block_rc)
    limit = int(min(max(need + (2 << 20), 32 << 20), 64 << 20))
    return pltpu.CompilerParams(dimension_semantics=("parallel",),
                                vmem_limit_bytes=limit)


def _offsets_and_coeff(start, stop, num_gaussians):
    if num_gaussians < 2:
        raise ValueError("num_gaussians must be >= 2")
    # Exact linspace values (matches the torch registered buffer) and coeff
    # computed from the f32 difference like (offset[1]-offset[0]).item().
    offset = jnp.linspace(start, stop, num_gaussians, dtype=jnp.float32)
    coeff = -0.5 / float(offset[1] - offset[0]) ** 2
    return offset, coeff


# -------------------------- wrappers -------------------------- #

def gaussian_smearing(dist, *, start=0.0, stop=5.0, num_gaussians=50, tm=4096):
    """Pallas TPU implementation of GaussianSmearing.forward.

    dist: any shape; flattened to (N,) like torch's .view(-1, 1).
    Returns (N, num_gaussians) float32 — identical layout to the PyTorch module.

    Note: the 50-wide last dim forces masked 50/128-lane stores; prefer
    gaussian_smearing_t (lane-dense) or gaussian_smearing_linear (fused) when
    the consumer allows it.
    """
    offset, coeff = _offsets_and_coeff(start, stop, num_gaussians)
    G = num_gaussians

    d = jnp.asarray(dist, jnp.float32).reshape(-1, 1)     # (N, 1)
    n = d.shape[0]
    tm_eff = _pick_tile(n, tm, 8)

    kernel = functools.partial(_smear_rows_kernel, coeff=coeff)
    return pl.pallas_call(
        kernel,
        out_shape=jax.ShapeDtypeStruct((n, G), jnp.float32),
        grid=(pl.cdiv(n, tm_eff),),
        in_specs=[
            pl.BlockSpec((tm_eff, 1), lambda i: (i, 0)),   # lane-padded in VMEM (accounted below)
            pl.BlockSpec((1, G), lambda i: (0, 0)),        # constant block index -> fetched once
        ],
        out_specs=pl.BlockSpec((tm_eff, G), lambda i: (i, 0)),
        compiler_params=_compiler_params((tm_eff, 1), (1, G), (tm_eff, G)),
    )(d, offset.reshape(1, G))


def gaussian_smearing_t(dist, *, start=0.0, stop=5.0, num_gaussians=50, tn=8192):
    """Lane-dense variant: returns (num_gaussians, N) == gaussian_smearing(dist).T.

    Recommended production layout: full unmasked 128-lane output stores and an
    un-padded (1, TN) input block. On v7x with large N, raise tn to 16384-32768
    (>= 2-4 MB of output per step) to match its 3.2 TB/s roofline.
    """
    offset, coeff = _offsets_and_coeff(start, stop, num_gaussians)
    G = num_gaussians

    d = jnp.asarray(dist, jnp.float32).reshape(1, -1)      # (1, N)
    n = d.shape[1]
    tn_eff = _pick_tile(n, tn, 128)

    kernel = functools.partial(_smear_cols_kernel, coeff=coeff)
    return pl.pallas_call(
        kernel,
        out_shape=jax.ShapeDtypeStruct((G, n), jnp.float32),
        grid=(pl.cdiv(n, tn_eff),),
        in_specs=[
            pl.BlockSpec((1, tn_eff), lambda i: (0, i)),
            pl.BlockSpec((G, 1), lambda i: (0, 0)),
        ],
        out_specs=pl.BlockSpec((G, tn_eff), lambda i: (0, i)),
        compiler_params=_compiler_params((1, tn_eff), (G, 1), (G, tn_eff)),
    )(d, offset.reshape(G, 1))


def gaussian_smearing_linear(dist, weight, bias=None, *, start=0.0, stop=5.0,
                             num_gaussians=50, tm=4096):
    """Fused GaussianSmearing + Linear(num_gaussians -> F).

    weight: (F, num_gaussians)  (torch nn.Linear layout); bias: (F,) or None.
    Returns (N, F) float32 == exp(coeff*(dist-offset)^2) @ weight.T + bias.
    The (N, num_gaussians) RBF array never hits HBM.
    """
    offset, coeff = _offsets_and_coeff(start, stop, num_gaussians)
    G = num_gaussians

    d = jnp.asarray(dist, jnp.float32).reshape(-1, 1)
    n = d.shape[0]
    w = jnp.asarray(weight, jnp.float32).T                 # (G, F)
    F = w.shape[1]
    b = (jnp.zeros((1, F), jnp.float32) if bias is None
         else jnp.asarray(bias, jnp.float32).reshape(1, F))
    tm_eff = _pick_tile(n, tm, 8)

    kernel = functools.partial(_smear_linear_kernel, coeff=coeff)
    return pl.pallas_call(
        kernel,
        out_shape=jax.ShapeDtypeStruct((n, F), jnp.float32),
        grid=(pl.cdiv(n, tm_eff),),
        in_specs=[
            pl.BlockSpec((tm_eff, 1), lambda i: (i, 0)),
            pl.BlockSpec((1, G), lambda i: (0, 0)),
            pl.BlockSpec((G, F), lambda i: (0, 0)),        # resident weight (constant index)
            pl.BlockSpec((1, F), lambda i: (0, 0)),
        ],
        out_specs=pl.BlockSpec((tm_eff, F), lambda i: (i, 0)),
        compiler_params=_compiler_params((tm_eff, 1), (1, G), (G, F), (1, F),
                                         (tm_eff, F)),
    )(d, offset.reshape(1, G), w, b)


# -------------------------- reference & test -------------------------- #

def _reference(dist, start=0.0, stop=5.0, num_gaussians=50):
    offset = jnp.linspace(start, stop, num_gaussians, dtype=jnp.float32)
    coeff = -0.5 / float(offset[1] - offset[0]) ** 2
    d = jnp.asarray(dist, jnp.float32).reshape(-1, 1) - offset.reshape(1, -1)
    return jnp.exp(coeff * d * d)


if __name__ == "__main__":
    key = jax.random.PRNGKey(0)
    k1, k2, k3, k4 = jax.random.split(key, 4)

    # (1) 1-D distance vector, length not a multiple of the tile: exercises the
    #     ragged-last-block path and the 2-way grid split (megacore).
    dist1 = jax.random.uniform(k1, (203,), dtype=jnp.float32, minval=0.0, maxval=5.0)
    out1 = jax.block_until_ready(gaussian_smearing(dist1))
    ref1 = _reference(dist1)
    assert out1.shape == (203, 50), out1.shape
    assert jnp.allclose(out1, ref1, atol=1e-4, rtol=1e-4), \
        float(jnp.max(jnp.abs(out1 - ref1)))

    # (2) 2-D dist input (flattened like torch's .view(-1, 1)).
    dist2 = jax.random.uniform(k2, (7, 9), dtype=jnp.float32, minval=0.0, maxval=5.0)
    out2 = jax.block_until_ready(gaussian_smearing(dist2))
    ref2 = _reference(dist2)
    assert out2.shape == (63, 50), out2.shape
    assert jnp.allclose(out2, ref2, atol=1e-4, rtol=1e-4), \
        float(jnp.max(jnp.abs(out2 - ref2)))

    # (3) Lane-dense transposed layout matches reference.T.
    out3 = jax.block_until_ready(gaussian_smearing_t(dist1))
    assert out3.shape == (50, 203), out3.shape
    assert jnp.allclose(out3, ref1.T, atol=1e-4, rtol=1e-4), \
        float(jnp.max(jnp.abs(out3 - ref1.T)))

    # (4) Fused RBF + Linear(50 -> 128) matches reference matmul.
    w = jax.random.normal(k3, (128, 50), dtype=jnp.float32) * 0.1
    b = jax.random.normal(k4, (128,), dtype=jnp.float32) * 0.1
    out4 = jax.block_until_ready(gaussian_smearing_linear(dist1, w, b))
    ref4 = jnp.dot(ref1, w.T, precision=jax.lax.Precision.HIGHEST) + b
    assert out4.shape == (203, 128), out4.shape
    assert jnp.allclose(out4, ref4, atol=5e-3, rtol=5e-3), \
        float(jnp.max(jnp.abs(out4 - ref4)))

    print("KERNEL_OK")
</pallas_src>

<mosaic_0001>
module attributes {stable_mosaic.version = 11 : i64} {
  func.func @_smear_rows_kernel(%arg0: i32, %arg1: memref<104x1xf32, #tpu.memory_space<vmem>>, %arg2: memref<1x50xf32, #tpu.memory_space<vmem>>, %arg3: memref<104x50xf32, #tpu.memory_space<vmem>>) attributes {dimension_semantics = [#tpu.dimension_semantics<parallel>], iteration_bounds = array<i64: 2>, scalar_prefetch = 0 : i64, scratch_operands = 0 : i64, tpu.core_type = #tpu.core_type<tc>, window_params = [{transform_indices = @transform_0, window_bounds = array<i64: 104, 1>}, {pipeline_mode = #tpu.pipeline_mode<synchronous>, transform_indices = @transform_1, window_bounds = array<i64: 1, 50>}, {transform_indices = @transform_2, window_bounds = array<i64: 104, 50>}]} {
    %c0 = arith.constant 0 : index
    %c0_0 = arith.constant 0 : index
    %0 = vector.load %arg1[%c0, %c0_0] : memref<104x1xf32, #tpu.memory_space<vmem>>, vector<104x1xf32>
    %c0_1 = arith.constant 0 : index
    %c0_2 = arith.constant 0 : index
    %1 = vector.load %arg2[%c0_1, %c0_2] : memref<1x50xf32, #tpu.memory_space<vmem>>, vector<1x50xf32>
    %2 = vector.broadcast %0 : vector<104x1xf32> to vector<104x50xf32>
    %3 = vector.broadcast %1 : vector<1x50xf32> to vector<104x50xf32>
    %4 = arith.subf %2, %3 : vector<104x50xf32>
    %cst = arith.constant -48.0200043 : f32
    %5 = vector.broadcast %cst : f32 to vector<104x50xf32>
    %6 = arith.mulf %5, %4 : vector<104x50xf32>
    %7 = arith.mulf %6, %4 : vector<104x50xf32>
    %8 = math.exp %7 : vector<104x50xf32>
    %c0_3 = arith.constant 0 : index
    %c0_4 = arith.constant 0 : index
    %9 = vector.load %arg3[%c0_3, %c0_4] : memref<104x50xf32, #tpu.memory_space<vmem>>, vector<104x50xf32>
    tpu.vector_store %arg3[%c0_3, %c0_4], %8 {strides = array<i32>} : memref<104x50xf32, #tpu.memory_space<vmem>>, vector<104x50xf32>,
    return
  }
  func.func @transform_0(%arg0: i32) -> (i32, i32) {
    %c0_i32 = arith.constant 0 : i32
    %c0_i32_0 = arith.constant 0 : i32
    return %arg0, %c0_i32 : i32, i32
  }
  func.func @transform_1(%arg0: i32) -> (i32, i32) {
    %c0_i32 = arith.constant 0 : i32
    %c0_i32_0 = arith.constant 0 : i32
    %c0_i32_1 = arith.constant 0 : i32
    return %c0_i32, %c0_i32_0 : i32, i32
  }
  func.func @transform_2(%arg0: i32) -> (i32, i32) {
    %c0_i32 = arith.constant 0 : i32
    %c0_i32_0 = arith.constant 0 : i32
    return %arg0, %c0_i32 : i32, i32
  }
}

</mosaic_0001>

<bundles_post_ra>
// kernel: tpu_custom_call.1
= control target key start
LH: loop header
LB: loop body
LE: loop exit
PB: predicated region body
PF: predicated region fallthrough
CT: control target
= control target key end

     0   :  { %s438_s9 = smov 0   ;;  %s508_s0 = inlined_call_operand.vmem [shape: f32[203,1], index: 0, kind: input, shape index: {}]   ;;  %s509_s1 = inlined_call_operand.vmem [shape: f32[1,50], index: 1, kind: input, shape index: {}]   ;;  %s510_s2 = inlined_call_operand.vmem [shape: f32[203,50], index: 2, kind: output, shape index: {}]  }
   0x1 LB: > { %s367_s10 = sadd.s32 4294967295, %s420_s9   ;;  %p371_p0 = scmp.ge.s32.totalorder %s420_s9, 1  ;;  %s420_s9 = sphi %s438_s9, %s12_s9  }
   0x2   : > { %p113_p1 = scmp.lt.s32.totalorder %s420_s9, 3 }
   0x4   : > { %p114_p2 = pnand %p371_p0, %p113_p1 }
   0x5   : > { %s135_s11 = smul.u32 (!%p114_p2), 13, %s367_s10  ;;  %v422_v0 = vmov (!%p114_p2), 0   ;;  %v457_v14 = vld [vmem:[%s509_s1] ss:$0 sm:$0xff] (!%p114_p2)  ;;  %vm297_vm0 = vcmask (!%p114_p2), 408576  }
   0x6   : > { %117 = sbr.rel (%p114_p2) target bundleno = 190 (0xbe), region = 28  ;;  %387 = vset.pattern.permute.xlu1 (!%p114_p2), %v422_v0  ;;  %386 = vset.pattern.permute.xlu0 (!%p114_p2), %v422_v0 }
   0x7   : > { %p136_p3 = scmp.lt.s32.totalorder (!%p114_p2), %s135_s11, 25 }
   0xd   : > { %s512_s11 = smov (!%p136_p3, %s135_s11), 25 }
   0xe   : > { %s372_s12 = sshll.u32 %s512_s11, 3 }
   0xf   : > { %s139_s15 = scalar_lea.vmem %s508_s0, %s372_s12  ;;  %s474_s20 = scalar_lea.vmem %s510_s2, %s372_s12 }
  0x10   : > { %v149_v1 = vld [vmem:[%s139_s15 + $0x10] sm:$0xff]  ;;  %v147_v2 = vld [vmem:[%s139_s15] sm:$0xff]  ;;  %v150_v3 = vld [vmem:[%s139_s15 + $0x18] sm:$0xff] }
  0x11   : > { %173 = vperm.xlu1 %387, %v149_v1   ;;  %163 = vperm.xlu0 %386, %v147_v2   ;;  %v148_v4 = vld [vmem:[%s139_s15 + $0x8] sm:$0xff]  ;;  %v151_v6 = vld [vmem:[%s139_s15 + $0x20] sm:$0xff]  ;;  %v154_v7 = vld [vmem:[%s139_s15 + $0x38] sm:$0xff] }
  0x12   : > { %v152_v5 = vld [vmem:[%s139_s15 + $0x28] sm:$0xff]  ;;  %v153_v8 = vld [vmem:[%s139_s15 + $0x30] sm:$0xff]  ;;  %v155_v10 = vld [vmem:[%s139_s15 + $0x40] sm:$0xff] }
  0x13   : > { %v156_v9 = vld [vmem:[%s139_s15 + $0x48] sm:$0xff]  ;;  %v158_v11 = vld [vmem:[%s139_s15 + $0x58] sm:$0xff]  ;;  %v157_v12 = vld [vmem:[%s139_s15 + $0x50] sm:$0xff] }
  0x14   : > { %v159_v13 = vld [vmem:[%s139_s15 + $0x60] sm:$0xff] }
  0x15   : > { %178 = vperm.xlu1 %387, %v150_v3   ;;  %168 = vperm.xlu0 %386, %v148_v4  }
  0x19   : > { %188 = vperm.xlu1 %387, %v152_v5   ;;  %183 = vperm.xlu0 %386, %v151_v6  }
  0x1d   : > { %198 = vperm.xlu1 %387, %v154_v7   ;;  %193 = vperm.xlu0 %386, %v153_v8  }
  0x21   : > { %208 = vperm.xlu1 %387, %v156_v9   ;;  %203 = vperm.xlu0 %386, %v155_v10  }
  0x25   : > { %218 = vperm.xlu1 %387, %v158_v11   ;;  %213 = vperm.xlu0 %386, %v157_v12  }
  0x29   : > { %223 = vperm.xlu0 %386, %v159_v13  }
  0x90   : > { %v174_v15 = vpop.permute.xlu1 %173  ;;  %v164_v16 = vpop.permute.xlu0 %163 }
  0x91   : > { %v234_v17 = vsub.f32 %v174_v15, %v457_v14  ;;  %v232_v18 = vsub.f32 %v164_v16, %v457_v14 }
  0x93   : > { %v247_v19 = vmul.f32 -48.020004, %v234_v17  ;;  %v245_v20 = vmul.f32 -48.020004, %v232_v18 }
  0x94   : > { %v179_v21 = vpop.permute.xlu1 %178  ;;  %v169_v22 = vpop.permute.xlu0 %168 }
  0x95   : > { %v260_v23 = vmul.f32 %v247_v19, %v234_v17  ;;  %v258_v24 = vmul.f32 %v245_v20, %v232_v18  ;;  %v235_v25 = vsub.f32 %v179_v21, %v457_v14  ;;  %v233_v26 = vsub.f32 %v169_v22, %v457_v14 }
  0x97   : > { %v275_v27 = vmul.f32 1.442695, %v260_v23  ;;  %v271_v28 = vmul.f32 1.442695, %v258_v24  ;;  %v248_v29 = vmul.f32 -48.020004, %v235_v25 }
  0x98   : > { %v246_v30 = vmul.f32 -48.020004, %v233_v26  ;;  %v189_v31 = vpop.permute.xlu1 %188  ;;  %v184_v32 = vpop.permute.xlu0 %183 }
  0x99   : > { %388 = vpow2.f32 %v275_v27  ;;  %v261_v33 = vmul.f32 %v248_v29, %v235_v25  ;;  %v237_v34 = vsub.f32 %v189_v31, %v457_v14  ;;  %v236_v35 = vsub.f32 %v184_v32, %v457_v14 }
  0x9a   : > { %390 = vpow2.f32 %v271_v28  ;;  %v259_v36 = vmul.f32 %v246_v30, %v233_v26 }
  0x9b   : > { %v277_v37 = vmul.f32 1.442695, %v261_v33  ;;  %v250_v38 = vmul.f32 -48.020004, %v237_v34  ;;  %v249_v39 = vmul.f32 -48.020004, %v236_v35 }
  0x9c   : > { %v273_v40 = vmul.f32 1.442695, %v259_v36  ;;  %v199_v41 = vpop.permute.xlu1 %198  ;;  %v194_v42 = vpop.permute.xlu0 %193 }
  0x9d   : > { %392 = vpow2.f32 %v277_v37  ;;  %v263_v43 = vmul.f32 %v250_v38, %v237_v34  ;;  %v262_v44 = vmul.f32 %v249_v39, %v236_v35  ;;  %v239_v45 = vsub.f32 %v199_v41, %v457_v14 }
  0x9e   : > { %394 = vpow2.f32 %v273_v40  ;;  %v238_v46 = vsub.f32 %v194_v42, %v457_v14 }
  0x9f   : > { %v281_v47 = vmul.f32 1.442695, %v263_v43  ;;  %v279_v48 = vmul.f32 1.442695, %v262_v44  ;;  %v252_v49 = vmul.f32 -48.020004, %v239_v45 }
  0xa0   : > { %v251_v50 = vmul.f32 -48.020004, %v238_v46  ;;  %v209_v51 = vpop.permute.xlu1 %208  ;;  %v204_v52 = vpop.permute.xlu0 %203 }
  0xa1   : > { %396 = vpow2.f32 %v281_v47  ;;  %v265_v53 = vmul.f32 %v252_v49, %v239_v45  ;;  %v241_v54 = vsub.f32 %v209_v51, %v457_v14  ;;  %v240_v55 = vsub.f32 %v204_v52, %v457_v14 }
  0xa2   : > { %398 = vpow2.f32 %v279_v48  ;;  %v264_v56 = vmul.f32 %v251_v50, %v238_v46 }
  0xa3   : > { %v389_v57 = vpop.eup %388  ;;  %v285_v58 = vmul.f32 1.442695, %v265_v53  ;;  %v254_v59 = vmul.f32 -48.020004, %v241_v54  ;;  %v253_v60 = vmul.f32 -48.020004, %v240_v55 }
  0xa4   : > { %v391_v61 = vpop.eup %390  ;;  %300 = vst.msk [vmem:[%s474_s20 + $0x10] sm:$0xff] %vm297_vm0, %v389_v57  ;;  %v283_v62 = vmul.f32 1.442695, %v264_v56  ;;  %v219_v63 = vpop.permute.xlu1 %218 }
  0xa5   : > { %v214_v0 = vpop.permute.xlu0 %213  ;;  %298 = vst.msk [vmem:[%s474_s20] sm:$0xff] %vm297_vm0, %v391_v61  ;;  %400 = vpow2.f32 %v285_v58  ;;  %v267_v1 = vmul.f32 %v254_v59, %v241_v54  ;;  %v266_v2 = vmul.f32 %v253_v60, %v240_v55  ;;  %v243_v3 = vsub.f32 %v219_v63, %v457_v14 }
  0xa6   : > { %402 = vpow2.f32 %v283_v62  ;;  %v242_v4 = vsub.f32 %v214_v0, %v457_v14 }
  0xa7   : > { %v393_v5 = vpop.eup %392  ;;  %v289_v6 = vmul.f32 1.442695, %v267_v1  ;;  %v287_v7 = vmul.f32 1.442695, %v266_v2  ;;  %v256_v8 = vmul.f32 -48.020004, %v243_v3 }
  0xa8   : > { %v395_v9 = vpop.eup %394  ;;  %301 = vst.msk [vmem:[%s474_s20 + $0x18] sm:$0xff] %vm297_vm0, %v393_v5  ;;  %v255_v10 = vmul.f32 -48.020004, %v242_v4 }
  0xa9   : > { %v224_v11 = vpop.permute.xlu0 %223  ;;  %299 = vst.msk [vmem:[%s474_s20 + $0x8] sm:$0xff] %vm297_vm0, %v395_v9  ;;  %404 = vpow2.f32 %v289_v6  ;;  %v269_v12 = vmul.f32 %v256_v8, %v243_v3 }
  0xaa   : > { %v244_v13 = vsub.f32 %v224_v11, %v457_v14  ;;  %406 = vpow2.f32 %v287_v7  ;;  %v268_v15 = vmul.f32 %v255_v10, %v242_v4 }
  0xab   : > { %v397_v16 = vpop.eup %396  ;;  %v293_v17 = vmul.f32 1.442695, %v269_v12 }
  0xac   : > { %v257_v18 = vmul.f32 -48.020004, %v244_v13  ;;  %v399_v19 = vpop.eup %398  ;;  %303 = vst.msk [vmem:[%s474_s20 + $0x28] sm:$0xff] %vm297_vm0, %v397_v16  ;;  %v291_v20 = vmul.f32 1.442695, %v268_v15 }
  0xad   : > { %302 = vst.msk [vmem:[%s474_s20 + $0x20] sm:$0xff] %vm297_vm0, %v399_v19  ;;  %408 = vpow2.f32 %v293_v17 }
  0xae   : > { %v270_v21 = vmul.f32 %v257_v18, %v244_v13  ;;  %410 = vpow2.f32 %v291_v20 }
  0xaf   : > { %v401_v14 = vpop.eup %400 }
  0xb0   : > { %v295_v22 = vmul.f32 1.442695, %v270_v21  ;;  %v403_v23 = vpop.eup %402  ;;  %305 = vst.msk [vmem:[%s474_s20 + $0x38] sm:$0xff] %vm297_vm0, %v401_v14 }
  0xb1   : > { %304 = vst.msk [vmem:[%s474_s20 + $0x30] sm:$0xff] %vm297_vm0, %v403_v23 }
  0xb2   : > { %412 = vpow2.f32 %v295_v22 }
  0xb3   : > { %v405_v24 = vpop.eup %404 }
  0xb4   : > { %v407_v25 = vpop.eup %406  ;;  %307 = vst.msk [vmem:[%s474_s20 + $0x48] sm:$0xff] %vm297_vm0, %v405_v24 }
  0xb5   : > { %306 = vst.msk [vmem:[%s474_s20 + $0x40] sm:$0xff] %vm297_vm0, %v407_v25 }
  0xb7   : > { %v409_v26 = vpop.eup %408 }
  0xb8   : > { %v411_v27 = vpop.eup %410  ;;  %309 = vst.msk [vmem:[%s474_s20 + $0x58] sm:$0xff] %vm297_vm0, %v409_v26 }
  0xb9   : > { %308 = vst.msk [vmem:[%s474_s20 + $0x50] sm:$0xff] %vm297_vm0, %v411_v27 }
  0xbc   : > { %v413_v28 = vpop.eup %412 }
  0xbd   : > { %310 = vst.msk [vmem:[%s474_s20 + $0x60] sm:$0xff] %vm297_vm0, %v413_v28 }
  0xbe PF: > { %s12_s9 = sadd.s32 1, %s420_s9  }
  0xbf   : > { %p9_p4 = scmp.ge.s32.totalorder %s12_s9, 4  }
  0xc1   :  { %11 = sbr.rel (!%p9_p4) target bundleno = 1 (0x1), region = 58 }

</bundles_post_ra>
